<compile_context>
chip_gen: v6e
topology: v6e:2x2x1
jax: 0.10.0
libtpu: 0.0.40
codegen_flags: <defaults>
</compile_context>

<pallas_src>
import functools
import math

import numpy as np
import jax
import jax.numpy as jnp
from jax import lax
from jax.experimental import pallas as pl
from jax.experimental.pallas import tpu as pltpu

_VMEM = functools.partial(pl.BlockSpec, memory_space=pltpu.MemorySpace.VMEM)
_SMEM = functools.partial(pl.BlockSpec, memory_space=pltpu.MemorySpace.SMEM)


# ---------------------------------------------------------------------------
# Constant operators (built once on the host in float64, cast at trace time).
# ---------------------------------------------------------------------------
def _haar_analysis(n):
    """Orthonormal 1-D Haar analysis matrix: rows [0, n/2) low-pass, rest high."""
    a = np.zeros((n, n), dtype=np.float64)
    r = 1.0 / math.sqrt(2.0)
    for k in range(n // 2):
        a[k, 2 * k] = r
        a[k, 2 * k + 1] = r
        a[n // 2 + k, 2 * k] = r
        a[n // 2 + k, 2 * k + 1] = -r
    return a


def _embed(mat, n):
    """blockdiag(mat, I): acts on the leading (current LL) Mallat block only."""
    out = np.eye(n, dtype=np.float64)
    m = mat.shape[0]
    out[:m, :m] = mat
    return out


@functools.lru_cache(maxsize=None)
def _build_constants(N, C, H, W):
    B = N * C
    h2, w2 = H // 2, W // 2
    eye_b = np.eye(B, dtype=np.float64)

    l1 = _haar_analysis(H)
    l2 = _embed(_haar_analysis(H // 2), H)
    l3 = _embed(_haar_analysis(H // 4), H)
    r1 = _haar_analysis(W)
    r2 = _embed(_haar_analysis(W // 2), W)
    r3 = _embed(_haar_analysis(W // 4), W)

    # Level-1 operators for the sublane-stacked [im ; de] slab.
    l1cat = np.kron(np.eye(2), l1)                       # (2H, 2H)
    r1big = np.kron(eye_b, r1.T)                         # (BW, BW)

    # Level-2 operators and level-3 composites (both act on d1 directly).
    r2big = np.kron(eye_b, r2.T)
    l32 = l3 @ l2
    r23big = r2big @ np.kron(eye_b, r3.T)
    lmats23 = np.stack([l2, l32], 0)                     # (2, H, H)
    rmats23 = np.stack([r2big, r23big], 0)               # (2, BW, BW)

    # Fused quadrant fold for the level-1 band norm:
    #   norm_sq = rows_hi @ (g_lo + g_hi) + rows_lo @ g_hi  -> one K=2BW matmul.
    g_lo = np.kron(eye_b, np.eye(W, w2))                 # width-low columns
    g_hi = np.kron(eye_b, np.eye(W, w2, k=-w2))          # width-high columns
    g_fused = np.concatenate([g_lo + g_hi, g_hi], axis=0)  # (2BW, B*w2)

    # Channel-sum (c-fold) and its composite with the separable-blur column op.
    csum = np.kron(np.eye(N), np.kron(np.ones((C, 1)), np.eye(w2)))  # (B*w2, N*w2)

    def tri(n):                                          # zero-padded [1,2.5,1] conv
        return 2.5 * np.eye(n) + np.eye(n, k=1) + np.eye(n, k=-1)

    cblur = tri(h2)                                      # (h2, h2) row blur
    csum_bd = csum @ np.kron(np.eye(N), tri(w2))         # csum followed by col blur
    cfold = np.stack([csum, csum_bd], 0)                 # (2, B*w2, N*w2)

    return l1cat, r1big, g_fused, lmats23, rmats23, cfold, cblur


# ---------------------------------------------------------------------------
# The fused kernel.
# ---------------------------------------------------------------------------
def _wavelet_loss_kernel(x_ref, l1_ref, r1_ref, gf_ref, lm_ref, rm_ref,
                         cf_ref, cb_ref, out_ref, *, dims, scales):
    H, W, h2, w2 = dims
    ls1, s2, s3, s4, s5 = scales
    bf16 = jnp.bfloat16

    def mm(a, b):
        return jnp.dot(a, b, preferred_element_type=jnp.float32)

    # ---- level-1 Haar / Mallat transform of [im ; de] (2 bf16 matmuls) ----
    t1 = mm(l1_ref[...], x_ref[...])                     # (2H, BW) f32
    m1 = mm(t1.astype(bf16), r1_ref[...])                # (2H, BW) f32

    # ---- loss1: MSE of 0.5 * blur(channel-sum(norm(level-1 bands))) ------
    sq = m1 * m1                                                       # f32, VPU
    hi = jnp.concatenate([sq[h2:H], sq[H + h2:2 * H]], axis=0)         # h-high rows
    lo = jnp.concatenate([sq[0:h2], sq[H:H + h2]], axis=0)             # h-low rows
    rows = jnp.concatenate([hi, lo], axis=1)                           # (H, 2BW)
    norm_sq = mm(rows.astype(bf16), gf_ref[...])         # (H, B*w2) = LH^2+HL^2+HH^2
    sn = jnp.sqrt(norm_sq)                               # f32 (EUP)
    sd = sn[0:h2] - sn[h2:H]                             # norm(im) - norm(de)
    # blur(csum(sd)) = cblur @ sd @ (csum @ colblur) - 1.25 * (sd @ csum)
    p = mm(cb_ref[...], sd)                              # (h2, B*w2)  f32 matmul
    conv = mm(p, cf_ref[1]) - 1.25 * mm(sd, cf_ref[0])   # (h2, N*w2)
    loss1 = ls1 * jnp.sum(conv * conv)

    # ---- losses 2..5 on the DWT of (im - de): one fused weighted reduction
    d1 = m1[0:H] - m1[H:2 * H]                           # level-1 Mallat diff
    d1b = d1.astype(bf16)
    d2 = mm(mm(lm_ref[0], d1b).astype(bf16), rm_ref[0])  # level-2 Mallat slab
    d3 = mm(mm(lm_ref[1], d1b).astype(bf16), rm_ref[1])  # level-3 Mallat slab

    row_i = lax.broadcasted_iota(jnp.int32, d1.shape, 0)
    col_i = lax.broadcasted_iota(jnp.int32, d1.shape, 1) & (W - 1)  # col % W (W=2^k)
    in1 = (row_i < h2) & (col_i < w2)                    # inside LL1
    in2 = (row_i < H // 4) & (col_i < W // 4)            # inside LL2
    in3 = (row_i < H // 8) & (col_i < W // 8)            # inside LL3
    acc = (jnp.abs(d1) * jnp.where(in1, 0.0, s2)         # loss2: Yh[0] L1
           + jnp.abs(d2) * jnp.where(in1 & ~in2, s3, 0.0)   # loss3: Yh[1] L1
           + jnp.abs(d3) * jnp.where(in2 & ~in3, s4, 0.0)   # loss4: Yh[2] L1
           + (d3 * d3) * jnp.where(in3, s5, 0.0))           # loss5: Yl MSE
    out_ref[0, 0] = loss1 + jnp.sum(acc)


# ---------------------------------------------------------------------------
# Wrapper (Wavelet_Net.forward equivalent).
# ---------------------------------------------------------------------------
def wavelet_net_forward(im, out):
    N, C, H, W = im.shape
    assert im.shape == out.shape
    assert (H % 8 == 0) and (W % 8 == 0), "J=3 Haar levels need H, W % 8 == 0"
    assert (W & (W - 1)) == 0, "in-kernel quadrant masks assume W is a power of 2"
    B = N * C
    h2, w2, h4, w4, h8, w8 = H // 2, W // 2, H // 4, W // 4, H // 8, W // 8

    (l1cat, r1big, g_fused, lmats23, rmats23, cfold,
     cblur) = _build_constants(N, C, H, W)

    # Loss scales (torch mean denominators + 0.5/0.25/0.125 weights + blur /14
    # and the 0.5^2 of the blur MSE) folded into compile-time constants.
    scales = (0.25 / (N * h2 * w2) / (14.0 * 14.0),      # loss1 (blur MSE)
              0.5 / (N * C * 3 * h2 * w2),               # loss2 (Yh[0] L1)
              0.25 / (N * C * 3 * h4 * w4),              # loss3 (Yh[1] L1)
              0.125 / (N * C * 3 * h8 * w8),             # loss4 (Yh[2] L1)
              0.125 * 0.125 / (N * C * h8 * w8))         # loss5 (Yl MSE)
    dims = (H, W, h2, w2)

    # Lane-dense layout: (N, C, H, W) -> (H, N*C*W); image (n, c) occupies the
    # contiguous column block [(n*C + c)*W, (n*C + c + 1)*W).  The two inputs
    # are stacked along sublanes -> (2H, N*C*W) so level 1 runs once for both.
    def to_slab(x):
        return jnp.transpose(x.astype(jnp.float32), (2, 0, 1, 3)).reshape(H, B * W)

    xcat = jnp.concatenate([to_slab(im), to_slab(out)],
                           axis=0).astype(jnp.bfloat16)

    bfc = lambda a: jnp.asarray(a, jnp.bfloat16)   # MXU operands
    f32c = lambda a: jnp.asarray(a, jnp.float32)   # tiny blur-tail operands

    kernel = functools.partial(_wavelet_loss_kernel, dims=dims, scales=scales)
    res = pl.pallas_call(
        kernel,
        out_shape=jax.ShapeDtypeStruct((1, 1), jnp.float32),
        in_specs=[_VMEM()] * 8,
        out_specs=_SMEM(),
    )(xcat, bfc(l1cat), bfc(r1big), bfc(g_fused), bfc(lmats23), bfc(rmats23),
      f32c(cfold), f32c(cblur))
    return res[0, 0]


# ---------------------------------------------------------------------------
# Pure-JAX reference (non-Pallas) used only for the self-check in __main__.
# ---------------------------------------------------------------------------
def _reference_forward(im, de):
    def dwt_level(x):
        a = x[:, :, 0::2, 0::2]
        b = x[:, :, 0::2, 1::2]
        c = x[:, :, 1::2, 0::2]
        d = x[:, :, 1::2, 1::2]
        return ((a + b + c + d) * 0.5,
                ((a - b + c - d) * 0.5, (a + b - c - d) * 0.5,
                 (a - b - c + d) * 0.5))

    def dwt3(x):
        ll, yh = x, []
        for _ in range(3):
            ll, bands = dwt_level(ll)
            yh.append(bands)
        return ll, yh

    yl_i, yh_i = dwt3(im)
    yl_d, yh_d = dwt3(de)
    kern = [[1.0, 2.5, 1.0], [2.5, 5.0, 2.5], [1.0, 2.5, 1.0]]

    # torch's blur has weight kernel.expand(N, C, 3, 3) (groups=1) so every
    # output channel equals conv(channel-sum(x), kernel); its MSE over the
    # replicated (N, N, h, w) output equals the MSE over (N, h, w) here.
    def blur_of_channel_summed_norm(bands):
        nrm = jnp.sqrt(bands[0] ** 2 + bands[1] ** 2 + bands[2] ** 2)
        s = jnp.sum(nrm, axis=1)
        n, h, w = s.shape
        pad = jnp.pad(s, ((0, 0), (1, 1), (1, 1)))
        acc = jnp.zeros_like(s)
        for di in range(3):
            for dj in range(3):
                acc = acc + kern[di][dj] * pad[:, di:di + h, dj:dj + w]
        return acc / 14.0

    b_i = blur_of_channel_summed_norm(yh_i[0])
    b_d = blur_of_channel_summed_norm(yh_d[0])
    loss1 = jnp.mean((0.5 * b_i - 0.5 * b_d) ** 2)

    def l1(bx, by, s):
        return jnp.mean(jnp.abs(jnp.stack(bx) * s - jnp.stack(by) * s))

    loss2 = l1(yh_i[0], yh_d[0], 0.5)
    loss3 = l1(yh_i[1], yh_d[1], 0.25)
    loss4 = l1(yh_i[2], yh_d[2], 0.125)
    loss5 = jnp.mean((0.125 * yl_i - 0.125 * yl_d) ** 2)
    return loss1 + loss2 + loss3 + loss4 + loss5


if __name__ == "__main__":
    key = jax.random.PRNGKey(0)
    k1, k2 = jax.random.split(key)
    im = jax.random.uniform(k1, (2, 4, 16, 16), dtype=jnp.float32)
    de = jax.random.uniform(k2, (2, 4, 16, 16), dtype=jnp.float32)

    loss = jax.jit(wavelet_net_forward)(im, de)
    jax.block_until_ready(loss)

    ref = _reference_forward(im, de)
    # Tolerance accounts for bf16 MXU operands (f32 accumulation everywhere).
    if not np.allclose(np.asarray(loss), np.asarray(ref), rtol=3e-2, atol=1e-4):
        raise AssertionError(
            f"Pallas result {float(loss)} != reference {float(ref)}")
    print("KERNEL_OK")
</pallas_src>

<mosaic_0001>
module attributes {stable_mosaic.version = 11 : i64} {
  func.func @_wavelet_loss_kernel(%arg0: memref<32x128xbf16, #tpu.memory_space<vmem>>, %arg1: memref<32x32xbf16, #tpu.memory_space<vmem>>, %arg2: memref<128x128xbf16, #tpu.memory_space<vmem>>, %arg3: memref<256x64xbf16, #tpu.memory_space<vmem>>, %arg4: memref<2x16x16xbf16, #tpu.memory_space<vmem>>, %arg5: memref<2x128x128xbf16, #tpu.memory_space<vmem>>, %arg6: memref<2x64x16xf32, #tpu.memory_space<vmem>>, %arg7: memref<8x8xf32, #tpu.memory_space<vmem>>, %arg8: memref<1x1xf32, #tpu.memory_space<smem>>) attributes {dimension_semantics = [], scalar_prefetch = 0 : i64, scratch_operands = 0 : i64, tpu.core_type = #tpu.core_type<tc>} {
    %c0 = arith.constant 0 : index
    %c0_0 = arith.constant 0 : index
    %0 = vector.load %arg1[%c0, %c0_0] : memref<32x32xbf16, #tpu.memory_space<vmem>>, vector<32x32xbf16>
    %c0_1 = arith.constant 0 : index
    %c0_2 = arith.constant 0 : index
    %1 = vector.load %arg0[%c0_1, %c0_2] : memref<32x128xbf16, #tpu.memory_space<vmem>>, vector<32x128xbf16>
    %cst = arith.constant dense<0.000000e+00> : vector<32x128xf32>
    %2 = tpu.matmul %0, %1, %cst {dimension_numbers = #tpu.dot_dimension_numbers<[1], [0], [0], [1], [0, 0, 1, 1], [], []>} : vector<32x32xbf16>, vector<32x128xbf16>, vector<32x128xf32> -> vector<32x128xf32>
    %3 = arith.truncf %2 : vector<32x128xf32> to vector<32x128xbf16>
    %c0_3 = arith.constant 0 : index
    %c0_4 = arith.constant 0 : index
    %4 = vector.load %arg2[%c0_3, %c0_4] : memref<128x128xbf16, #tpu.memory_space<vmem>>, vector<128x128xbf16>
    %cst_5 = arith.constant dense<0.000000e+00> : vector<32x128xf32>
    %5 = tpu.matmul %3, %4, %cst_5 {dimension_numbers = #tpu.dot_dimension_numbers<[1], [0], [0], [1], [0, 0, 1, 1], [], []>} : vector<32x128xbf16>, vector<128x128xbf16>, vector<32x128xf32> -> vector<32x128xf32>
    %6 = arith.mulf %5, %5 : vector<32x128xf32>
    %7 = vector.extract_strided_slice %6 {offsets = [8, 0], sizes = [8, 128], strides = [1, 1]} : vector<32x128xf32> to vector<8x128xf32>
    %8 = vector.extract_strided_slice %6 {offsets = [24, 0], sizes = [8, 128], strides = [1, 1]} : vector<32x128xf32> to vector<8x128xf32>
    %9 = tpu.concatenate %7, %8 in 0 : vector<8x128xf32>, vector<8x128xf32> -> vector<16x128xf32>
    %10 = vector.extract_strided_slice %6 {offsets = [0, 0], sizes = [8, 128], strides = [1, 1]} : vector<32x128xf32> to vector<8x128xf32>
    %11 = vector.extract_strided_slice %6 {offsets = [16, 0], sizes = [8, 128], strides = [1, 1]} : vector<32x128xf32> to vector<8x128xf32>
    %12 = tpu.concatenate %10, %11 in 0 : vector<8x128xf32>, vector<8x128xf32> -> vector<16x128xf32>
    %13 = tpu.concatenate %9, %12 in 1 : vector<16x128xf32>, vector<16x128xf32> -> vector<16x256xf32>
    %14 = arith.truncf %13 : vector<16x256xf32> to vector<16x256xbf16>
    %c0_6 = arith.constant 0 : index
    %c0_7 = arith.constant 0 : index
    %15 = vector.load %arg3[%c0_6, %c0_7] : memref<256x64xbf16, #tpu.memory_space<vmem>>, vector<256x64xbf16>
    %cst_8 = arith.constant dense<0.000000e+00> : vector<16x64xf32>
    %16 = tpu.matmul %14, %15, %cst_8 {dimension_numbers = #tpu.dot_dimension_numbers<[1], [0], [0], [1], [0, 0, 1, 1], [], []>} : vector<16x256xbf16>, vector<256x64xbf16>, vector<16x64xf32> -> vector<16x64xf32>
    %17 = math.sqrt %16 : vector<16x64xf32>
    %18 = vector.extract_strided_slice %17 {offsets = [0, 0], sizes = [8, 64], strides = [1, 1]} : vector<16x64xf32> to vector<8x64xf32>
    %19 = vector.extract_strided_slice %17 {offsets = [8, 0], sizes = [8, 64], strides = [1, 1]} : vector<16x64xf32> to vector<8x64xf32>
    %20 = arith.subf %18, %19 : vector<8x64xf32>
    %c0_9 = arith.constant 0 : index
    %c0_10 = arith.constant 0 : index
    %21 = vector.load %arg7[%c0_9, %c0_10] : memref<8x8xf32, #tpu.memory_space<vmem>>, vector<8x8xf32>
    %cst_11 = arith.constant dense<0.000000e+00> : vector<8x64xf32>
    %22 = tpu.matmul %21, %20, %cst_11 {dimension_numbers = #tpu.dot_dimension_numbers<[1], [0], [0], [1], [0, 0, 1, 1], [], []>} : vector<8x8xf32>, vector<8x64xf32>, vector<8x64xf32> -> vector<8x64xf32>
    %c1 = arith.constant 1 : index
    %c0_12 = arith.constant 0 : index
    %c0_13 = arith.constant 0 : index
    %23 = vector.load %arg6[%c1, %c0_12, %c0_13] : memref<2x64x16xf32, #tpu.memory_space<vmem>>, vector<1x64x16xf32>
    %24 = vector.shape_cast %23 : vector<1x64x16xf32> to vector<64x16xf32>
    %cst_14 = arith.constant dense<0.000000e+00> : vector<8x16xf32>
    %25 = tpu.matmul %22, %24, %cst_14 {dimension_numbers = #tpu.dot_dimension_numbers<[1], [0], [0], [1], [0, 0, 1, 1], [], []>} : vector<8x64xf32>, vector<64x16xf32>, vector<8x16xf32> -> vector<8x16xf32>
    %c0_15 = arith.constant 0 : index
    %c0_16 = arith.constant 0 : index
    %c0_17 = arith.constant 0 : index
    %26 = vector.load %arg6[%c0_15, %c0_16, %c0_17] : memref<2x64x16xf32, #tpu.memory_space<vmem>>, vector<1x64x16xf32>
    %27 = vector.shape_cast %26 : vector<1x64x16xf32> to vector<64x16xf32>
    %cst_18 = arith.constant dense<0.000000e+00> : vector<8x16xf32>
    %28 = tpu.matmul %20, %27, %cst_18 {dimension_numbers = #tpu.dot_dimension_numbers<[1], [0], [0], [1], [0, 0, 1, 1], [], []>} : vector<8x64xf32>, vector<64x16xf32>, vector<8x16xf32> -> vector<8x16xf32>
    %cst_19 = arith.constant 1.250000e+00 : f32
    %29 = vector.broadcast %cst_19 : f32 to vector<8x16xf32>
    %30 = arith.mulf %29, %28 : vector<8x16xf32>
    %31 = arith.subf %25, %30 : vector<8x16xf32>
    %32 = arith.mulf %31, %31 : vector<8x16xf32>
    %33 = vector.shape_cast %32 : vector<8x16xf32> to vector<1x8x16xf32>
    %cst_20 = arith.constant dense<0.000000e+00> : vector<1xf32>
    %34 = vector.multi_reduction <add>, %33, %cst_20 [1, 2] : vector<1x8x16xf32> to vector<1xf32>
    %35 = vector.shape_cast %34 : vector<1xf32> to vector<1x1x1xf32>
    %36 = vector.extract %35[0, 0, 0] : f32 from vector<1x1x1xf32>
    %cst_21 = arith.constant 9.96492326E-6 : f32
    %37 = arith.mulf %cst_21, %36 : f32
    %38 = vector.extract_strided_slice %5 {offsets = [0, 0], sizes = [16, 128], strides = [1, 1]} : vector<32x128xf32> to vector<16x128xf32>
    %39 = vector.extract_strided_slice %5 {offsets = [16, 0], sizes = [16, 128], strides = [1, 1]} : vector<32x128xf32> to vector<16x128xf32>
    %40 = arith.subf %38, %39 : vector<16x128xf32>
    %41 = arith.truncf %40 : vector<16x128xf32> to vector<16x128xbf16>
    %c0_22 = arith.constant 0 : index
    %c0_23 = arith.constant 0 : index
    %c0_24 = arith.constant 0 : index
    %42 = vector.load %arg4[%c0_22, %c0_23, %c0_24] : memref<2x16x16xbf16, #tpu.memory_space<vmem>>, vector<1x16x16xbf16>
    %43 = vector.shape_cast %42 : vector<1x16x16xbf16> to vector<16x16xbf16>
    %cst_25 = arith.constant dense<0.000000e+00> : vector<16x128xf32>
    %44 = tpu.matmul %43, %41, %cst_25 {dimension_numbers = #tpu.dot_dimension_numbers<[1], [0], [0], [1], [0, 0, 1, 1], [], []>} : vector<16x16xbf16>, vector<16x128xbf16>, vector<16x128xf32> -> vector<16x128xf32>
    %45 = arith.truncf %44 : vector<16x128xf32> to vector<16x128xbf16>
    %c0_26 = arith.constant 0 : index
    %c0_27 = arith.constant 0 : index
    %c0_28 = arith.constant 0 : index
    %46 = vector.load %arg5[%c0_26, %c0_27, %c0_28] : memref<2x128x128xbf16, #tpu.memory_space<vmem>>, vector<1x128x128xbf16>
    %47 = vector.shape_cast %46 : vector<1x128x128xbf16> to vector<128x128xbf16>
    %cst_29 = arith.constant dense<0.000000e+00> : vector<16x128xf32>
    %48 = tpu.matmul %45, %47, %cst_29 {dimension_numbers = #tpu.dot_dimension_numbers<[1], [0], [0], [1], [0, 0, 1, 1], [], []>} : vector<16x128xbf16>, vector<128x128xbf16>, vector<16x128xf32> -> vector<16x128xf32>
    %c1_30 = arith.constant 1 : index
    %c0_31 = arith.constant 0 : index
    %c0_32 = arith.constant 0 : index
    %49 = vector.load %arg4[%c1_30, %c0_31, %c0_32] : memref<2x16x16xbf16, #tpu.memory_space<vmem>>, vector<1x16x16xbf16>
    %50 = vector.shape_cast %49 : vector<1x16x16xbf16> to vector<16x16xbf16>
    %cst_33 = arith.constant dense<0.000000e+00> : vector<16x128xf32>
    %51 = tpu.matmul %50, %41, %cst_33 {dimension_numbers = #tpu.dot_dimension_numbers<[1], [0], [0], [1], [0, 0, 1, 1], [], []>} : vector<16x16xbf16>, vector<16x128xbf16>, vector<16x128xf32> -> vector<16x128xf32>
    %52 = arith.truncf %51 : vector<16x128xf32> to vector<16x128xbf16>
    %c1_34 = arith.constant 1 : index
    %c0_35 = arith.constant 0 : index
    %c0_36 = arith.constant 0 : index
    %53 = vector.load %arg5[%c1_34, %c0_35, %c0_36] : memref<2x128x128xbf16, #tpu.memory_space<vmem>>, vector<1x128x128xbf16>
    %54 = vector.shape_cast %53 : vector<1x128x128xbf16> to vector<128x128xbf16>
    %cst_37 = arith.constant dense<0.000000e+00> : vector<16x128xf32>
    %55 = tpu.matmul %52, %54, %cst_37 {dimension_numbers = #tpu.dot_dimension_numbers<[1], [0], [0], [1], [0, 0, 1, 1], [], []>} : vector<16x128xbf16>, vector<128x128xbf16>, vector<16x128xf32> -> vector<16x128xf32>
    %56 = tpu.iota {dimensions = array<i32: 0>} : vector<16x128xi32>
    %57 = tpu.iota {dimensions = array<i32: 1>} : vector<16x128xi32>
    %c15_i32 = arith.constant 15 : i32
    %58 = vector.broadcast %c15_i32 : i32 to vector<16x128xi32>
    %59 = arith.andi %57, %58 : vector<16x128xi32>
    %c8_i32 = arith.constant 8 : i32
    %60 = vector.broadcast %c8_i32 : i32 to vector<16x128xi32>
    %61 = arith.cmpi slt, %56, %60 : vector<16x128xi32>
    %c8_i32_38 = arith.constant 8 : i32
    %62 = vector.broadcast %c8_i32_38 : i32 to vector<16x128xi32>
    %63 = arith.cmpi slt, %59, %62 : vector<16x128xi32>
    %64 = arith.andi %61, %63 : vector<16x128xi1>
    %c4_i32 = arith.constant 4 : i32
    %65 = vector.broadcast %c4_i32 : i32 to vector<16x128xi32>
    %66 = arith.cmpi slt, %56, %65 : vector<16x128xi32>
    %c4_i32_39 = arith.constant 4 : i32
    %67 = vector.broadcast %c4_i32_39 : i32 to vector<16x128xi32>
    %68 = arith.cmpi slt, %59, %67 : vector<16x128xi32>
    %69 = arith.andi %66, %68 : vector<16x128xi1>
    %c2_i32 = arith.constant 2 : i32
    %70 = vector.broadcast %c2_i32 : i32 to vector<16x128xi32>
    %71 = arith.cmpi slt, %56, %70 : vector<16x128xi32>
    %c2_i32_40 = arith.constant 2 : i32
    %72 = vector.broadcast %c2_i32_40 : i32 to vector<16x128xi32>
    %73 = arith.cmpi slt, %59, %72 : vector<16x128xi32>
    %74 = arith.andi %71, %73 : vector<16x128xi1>
    %75 = math.absf %40 : vector<16x128xf32>
    %cst_41 = arith.constant 0.000000e+00 : f32
    %cst_42 = arith.constant 3.25520843E-4 : f32
    %76 = vector.broadcast %cst_41 : f32 to vector<16x128xf32>
    %77 = vector.broadcast %cst_42 : f32 to vector<16x128xf32>
    %78 = arith.select %64, %76, %77 : vector<16x128xi1>, vector<16x128xf32>
    %79 = arith.mulf %75, %78 : vector<16x128xf32>
    %80 = math.absf %48 : vector<16x128xf32>
    %cst_43 = arith.constant dense<true> : vector<16x128xi1>
    %81 = arith.xori %69, %cst_43 : vector<16x128xi1>
    %82 = arith.andi %64, %81 : vector<16x128xi1>
    %cst_44 = arith.constant 6.51041686E-4 : f32
    %cst_45 = arith.constant 0.000000e+00 : f32
    %83 = vector.broadcast %cst_44 : f32 to vector<16x128xf32>
    %84 = vector.broadcast %cst_45 : f32 to vector<16x128xf32>
    %85 = arith.select %82, %83, %84 : vector<16x128xi1>, vector<16x128xf32>
    %86 = arith.mulf %80, %85 : vector<16x128xf32>
    %87 = arith.addf %79, %86 : vector<16x128xf32>
    %88 = math.absf %55 : vector<16x128xf32>
    %cst_46 = arith.constant dense<true> : vector<16x128xi1>
    %89 = arith.xori %74, %cst_46 : vector<16x128xi1>
    %90 = arith.andi %69, %89 : vector<16x128xi1>
    %cst_47 = arith.constant 0.00130208337 : f32
    %cst_48 = arith.constant 0.000000e+00 : f32
    %91 = vector.broadcast %cst_47 : f32 to vector<16x128xf32>
    %92 = vector.broadcast %cst_48 : f32 to vector<16x128xf32>
    %93 = arith.select %90, %91, %92 : vector<16x128xi1>, vector<16x128xf32>
    %94 = arith.mulf %88, %93 : vector<16x128xf32>
    %95 = arith.addf %87, %94 : vector<16x128xf32>
    %96 = arith.mulf %55, %55 : vector<16x128xf32>
    %cst_49 = arith.constant 4.8828125E-4 : f32
    %cst_50 = arith.constant 0.000000e+00 : f32
    %97 = vector.broadcast %cst_49 : f32 to vector<16x128xf32>
    %98 = vector.broadcast %cst_50 : f32 to vector<16x128xf32>
    %99 = arith.select %74, %97, %98 : vector<16x128xi1>, vector<16x128xf32>
    %100 = arith.mulf %96, %99 : vector<16x128xf32>
    %101 = arith.addf %95, %100 : vector<16x128xf32>
    %102 = vector.shape_cast %101 : vector<16x128xf32> to vector<1x16x128xf32>
    %cst_51 = arith.constant dense<0.000000e+00> : vector<1xf32>
    %103 = vector.multi_reduction <add>, %102, %cst_51 [1, 2] : vector<1x16x128xf32> to vector<1xf32>
    %104 = vector.shape_cast %103 : vector<1xf32> to vector<1x1x1xf32>
    %105 = vector.extract %104[0, 0, 0] : f32 from vector<1x1x1xf32>
    %106 = arith.addf %37, %105 : f32
    %c0_52 = arith.constant 0 : index
    %c0_53 = arith.constant 0 : index
    %107 = memref.load %arg8[%c0_52, %c0_53] : memref<1x1xf32, #tpu.memory_space<smem>>
    memref.store %106, %arg8[%c0_52, %c0_53] : memref<1x1xf32, #tpu.memory_space<smem>>
    return
  }
}

</mosaic_0001>

<bundles_post_ra>
// kernel: wavelet_net_forward.1
= control target key start
LH: loop header
LB: loop body
LE: loop exit
PB: predicated region body
PF: predicated region fallthrough
CT: control target
= control target key end

     0   :  { %vm61_vm0 = vcmask 261120   ;;  %s1750_s0 = inlined_call_operand.vmem [shape: bf16[32,128], index: 0, kind: input, shape index: {}]   ;;  %s1751_s1 = inlined_call_operand.vmem [shape: bf16[32,32], index: 1, kind: input, shape index: {}]   ;;  %s1752_s2 = inlined_call_operand.vmem [shape: bf16[128,128], index: 2, kind: input, shape index: {}]   ;;  %s1753_s3 = inlined_call_operand.vmem [shape: bf16[256,64], index: 3, kind: input, shape index: {}]   ;;  %s1754_s4 = inlined_call_operand.vmem [shape: bf16[2,16,16], index: 4, kind: input, shape index: {}]   ;;  %s1755_s5 = inlined_call_operand.vmem [shape: bf16[2,128,128], index: 5, kind: input, shape index: {}]   ;;  %s1756_s6 = inlined_call_operand.vmem [shape: f32[2,64,16], index: 6, kind: input, shape index: {}]   ;;  %s1757_s7 = inlined_call_operand.vmem [shape: f32[8,8], index: 7, kind: input, shape index: {}]   ;;  %s1758_s8 = inlined_call_operand.hbm [shape: f32[1,1], index: 8, kind: output, shape index: {}]  }
   0x1   :  { %v1369_v0 = vld [vmem:[%s1750_s0 + $0x8] sm:$0xff]   ;;  %v1370_v1 = vld [vmem:[%s1750_s0] sm:$0xff]   ;;  %v1373_v3 = vld [vmem:[%s1752_s2 + $0x38] sm:$0xff]  }
   0x2   :  { %1237 = vmatprep.subr.bf16.mxu0 %v1369_v0  ;;  %v1371_v2 = vld [vmem:[%s1751_s1] sm:$0xff]   ;;  %v1374_v4 = vld [vmem:[%s1752_s2 + $0x30] sm:$0xff]   ;;  %v1372_v5 = vld [vmem:[%s1751_s1 + $0x8] sm:$0xff]   ;;  %1245 = vmatprep.subr.bf16.mxu1 %v1373_v3 }
   0x3   :  { %1238 = vmatpush3.bf16.msra.mxu0 %v1369_v0  ;;  %1241 = vmatprep.mubr.msk.bf16.mxu0 %vm61_vm0, %v1371_v2  ;;  %v1375_v6 = vld [vmem:[%s1752_s2 + $0x28] sm:$0xff]   ;;  %v1376_v7 = vld [vmem:[%s1752_s2 + $0x20] sm:$0xff]   ;;  %v1377_v8 = vld [vmem:[%s1752_s2 + $0x18] sm:$0xff]  }
   0x4   :  { %1239 = vmatprep.subr.bf16.mxu0 %v1370_v1  ;;  %1246 = vmatpush3.bf16.msra.mxu1 %v1373_v3  ;;  %v1378_v9 = vld [vmem:[%s1752_s2 + $0x10] sm:$0xff]  }
   0x5   :  { %1247 = vmatprep.subr.bf16.mxu1 %v1374_v4 }
   0x7   :  { %1240 = vmatpush3.bf16.msra.mxu0 %v1370_v1 }
   0x8   :  { %1248 = vmatpush3.bf16.msra.mxu1 %v1374_v4 }
   0x9   :  { %1249 = vmatprep.subr.bf16.mxu1 %v1375_v6 }
   0xa   :  { %1242 = vmatmul.mubr.msk.bf16.vlgmr.msra.gmra.mxu0 %vm61_vm0, %v1372_v5 }
   0xc   :  { %1250 = vmatpush3.bf16.msra.mxu1 %v1375_v6 }
   0xd   :  { %1251 = vmatprep.subr.bf16.mxu1 %v1376_v7 }
  0x10   :  { %1252 = vmatpush3.bf16.msra.mxu1 %v1376_v7 }
  0x11   :  { %1253 = vmatprep.subr.bf16.mxu1 %v1377_v8 }
  0x14   :  { %1254 = vmatpush3.bf16.msra.mxu1 %v1377_v8 }
  0x15   :  { %1255 = vmatprep.subr.bf16.mxu1 %v1378_v9 }
  0x18   :  { %1256 = vmatpush3.bf16.msra.mxu1 %v1378_v9 }
  0x19   :  { %13 = vsyncpa [#allocation3], 0  ;;  %v1379_v10 = vld [vmem:[%s1752_s2 + $0x8] sm:$0xff]   ;;  %v1380_v11 = vld [vmem:[%s1752_s2] sm:$0xff]   ;;  %v1429_v47 = vmov 0.0   ;;  %vm1430_vm1 = vmmov 0  }
  0x1a   :  { %1257 = vmatprep.subr.bf16.mxu1 %v1379_v10  ;;  %v1381_v12 = vld [vmem:[%s1753_s3 + $0x78] sm:$0xff]   ;;  %v1383_v14 = vld [vmem:[%s1753_s3 + $0x70] sm:$0xff]   ;;  %v1385_v16 = vld [vmem:[%s1753_s3 + $0x68] sm:$0xff]   ;;  %vm423_vm6 = vcmask 64512   ;;  %vm506_vm7 = vcmask 523264   ;;  %vm664_vm8 = vcmask 130048  }
  0x1b   :  { %v1382_v13 = vld [vmem:[%s1753_s3 + $0x38] sm:$0xff]   ;;  %1173 = vmatprep.subr.bf16.mxu0 %v1381_v12  ;;  %v1384_v15 = vld [vmem:[%s1753_s3 + $0x30] sm:$0xff]   ;;  %v1386_v17 = vld [vmem:[%s1753_s3 + $0x28] sm:$0xff]   ;;  %vm1431_vm12 = vmmov 1   ;;  %s1433_s24 = smov [#allocation2]  }
  0x1c   :  { %1258 = vmatpush3.bf16.msra.mxu1 %v1379_v10  ;;  %1174 = vmatpush3.bf16.msra.mxu0 %v1382_v13  ;;  %v1387_v18 = vld [vmem:[%s1753_s3 + $0x60] sm:$0xff]   ;;  %v1389_v20 = vld [vmem:[%s1753_s3 + $0x58] sm:$0xff]   ;;  %v1391_v22 = vld [vmem:[%s1753_s3 + $0x50] sm:$0xff]  }
  0x1d   :  { %1259 = vmatprep.subr.bf16.mxu1 %v1380_v11  ;;  %1175 = vmatprep.subr.bf16.mxu0 %v1383_v14  ;;  %v1388_v19 = vld [vmem:[%s1753_s3 + $0x20] sm:$0xff]   ;;  %v1390_v21 = vld [vmem:[%s1753_s3 + $0x18] sm:$0xff]   ;;  %v1392_v29 = vld [vmem:[%s1753_s3 + $0x10] sm:$0xff]  }
  0x1e   :  { %v1393_v30 = vld [vmem:[%s1753_s3 + $0x48] sm:$0xff]   ;;  %v1395_v32 = vld [vmem:[%s1753_s3 + $0x40] sm:$0xff]   ;;  %v1118_v48 = vld [vmem:[%s1756_s6 + $0x78] sm:$0xff] }
  0x1f   :  { %v1394_v31 = vld [vmem:[%s1753_s3 + $0x8] sm:$0xff]   ;;  %v1396_v33 = vld [vmem:[%s1753_s3] sm:$0xff]   ;;  %v1117_v49 = vld [vmem:[%s1756_s6 + $0x70] sm:$0xff] }
  0x20   :  { %1260 = vmatpush3.bf16.msra.mxu1 %v1380_v11  ;;  %1176 = vmatpush3.bf16.msra.mxu0 %v1384_v15  ;;  %v1116_v50 = vld [vmem:[%s1756_s6 + $0x68] sm:$0xff]  ;;  %v1115_v51 = vld [vmem:[%s1756_s6 + $0x60] sm:$0xff]  ;;  %v1114_v52 = vld [vmem:[%s1756_s6 + $0x58] sm:$0xff] }
  0x21   :  { %1177 = vmatprep.subr.bf16.mxu0 %v1385_v16  ;;  %1265 = vmatprep.subr.mxu1 %v1429_v47  ;;  %v1113_v53 = vld [vmem:[%s1756_s6 + $0x50] sm:$0xff]  ;;  %v1112_v54 = vld [vmem:[%s1756_s6 + $0x48] sm:$0xff]  ;;  %v1111_v55 = vld [vmem:[%s1756_s6 + $0x40] sm:$0xff] }
  0x22   :  { %v422_v9 = vld [vmem:[%s1757_s7] sm:$0xff]  ;;  %v587_v10 = vld [vmem:[%s1756_s6 + $0x38] sm:$0xff]  ;;  %v586_v11 = vld [vmem:[%s1756_s6 + $0x30] sm:$0xff] }
  0x23   :  { %v585_v12 = vld [vmem:[%s1756_s6 + $0x28] sm:$0xff]  ;;  %v584_v13 = vld [vmem:[%s1756_s6 + $0x20] sm:$0xff]  ;;  %v583_v14 = vld [vmem:[%s1756_s6 + $0x18] sm:$0xff] }
  0x24   :  { %1178 = vmatpush3.bf16.msra.mxu0 %v1386_v17  ;;  %v582_v15 = vld [vmem:[%s1756_s6 + $0x10] sm:$0xff]  ;;  %v581_v16 = vld [vmem:[%s1756_s6 + $0x8] sm:$0xff]  ;;  %v580_v17 = vld [vmem:[%s1756_s6] sm:$0xff] }
  0x25   :  { %1179 = vmatprep.subr.bf16.mxu0 %v1387_v18  ;;  %v1397_v18 = vld [vmem:[%s1754_s4] sm:$0xff]  }
  0x28   :  { %1180 = vmatpush3.bf16.msra.mxu0 %v1388_v19  ;;  %v1398_v19 = vld [vmem:[%s1755_s5 + $0x38] sm:$0xff]  }
  0x29   :  { %1181 = vmatprep.subr.bf16.mxu0 %v1389_v20  ;;  %v1399_v20 = vld [vmem:[%s1755_s5 + $0x30] sm:$0xff]  }
  0x2c   :  { %1182 = vmatpush3.bf16.msra.mxu0 %v1390_v21  ;;  %v1400_v21 = vld [vmem:[%s1755_s5 + $0x28] sm:$0xff]  }
  0x2d   :  { %1183 = vmatprep.subr.bf16.mxu0 %v1391_v22  ;;  %v1402_v22 = vld [vmem:[%s1755_s5 + $0x20] sm:$0xff]  }
  0x30   :  { %1184 = vmatpush3.bf16.msra.mxu0 %v1392_v29 }
  0x31   :  { %1185 = vmatprep.subr.bf16.mxu0 %v1393_v30  ;;  %v1407_v30 = vld [vmem:[%s1755_s5 + $0x78] sm:$0xff]  }
  0x34   :  { %1186 = vmatpush3.bf16.msra.mxu0 %v1394_v31  ;;  %v1408_v31 = vld [vmem:[%s1755_s5 + $0x70] sm:$0xff]  }
  0x35   :  { %1187 = vmatprep.subr.bf16.mxu0 %v1395_v32  ;;  %v1409_v32 = vld [vmem:[%s1755_s5 + $0x68] sm:$0xff]  }
  0x38   :  { %1188 = vmatpush3.bf16.msra.mxu0 %v1396_v33  ;;  %v1410_v33 = vld [vmem:[%s1755_s5 + $0x60] sm:$0xff]  }
  0x39   :  { %1270 = vmatprep.subr.mxu0 %v1429_v47 }
  0xca   :  { %v1243_v23 = vpop.f32.mrf.mxu0 }
  0xcc   :  { %v102_v24 = vpop.f32.mrf.mxu0 }
  0xce   :  { %v1244_v25 = vpop.f32.mrf.mxu0 }
  0xcf   :  { %v118_v28 = vpack.c.bf16 %v1244_v25, %v1243_v23  ;;  %v1403_v23 = vld [vmem:[%s1755_s5 + $0x18] sm:$0xff]   ;;  %v1405_v25 = vld [vmem:[%s1755_s5 + $0x8] sm:$0xff]  }
  0xd0   :  { %v105_v26 = vpop.f32.mrf.mxu0 }
  0xd1   :  { %v117_v27 = vpack.c.bf16 %v105_v26, %v102_v24  ;;  %v1404_v24 = vld [vmem:[%s1755_s5 + $0x10] sm:$0xff]   ;;  %v1406_v26 = vld [vmem:[%s1755_s5] sm:$0xff]  }
  0xd3   :  { %1261 = vmatprep.mubr.bf16.mxu1 %v117_v27 }
  0xd4   :  { %1262 = vmatmul.mubr.bf16.vlgmr.msra.gmra.mxu1 %v118_v28  ;;  %v1401_v28 = vld [vmem:[%s1754_s4 + $0x8] sm:$0xff]  }
  0xd5   :  { %1267 = vmatprep.mubr.msk.f32.mxu1 %vm1430_vm1, %v1429_v47 }
 0x194   :  { %v1263_v34 = vpop.f32.mrf.mxu1 }
 0x195   :  { %v234_v36 = vmul.f32 %v1263_v34, %v1263_v34 }
 0x196   :  { %v217_v35 = vpop.f32.mrf.mxu1 }
 0x197   :  { %v232_v37 = vmul.f32 %v217_v35, %v217_v35  ;;  %v1563_v38 = vsub.f32 %v217_v35, %v1263_v34 }
 0x198   :  { %v1264_v39 = vpop.f32.mrf.mxu1 }
 0x199   :  { %v237_v40 = vpack.c.bf16 %v234_v36, %v232_v37  ;;  %v235_v42 = vmul.f32 %v1264_v39, %v1264_v39  ;;  %v1411_v36 = vld [vmem:[%s1755_s5 + $0x58] sm:$0xff]  }
 0x19a   :  { %v220_v41 = vpop.f32.mrf.mxu1 }
 0x19b   :  { %v233_v43 = vmul.f32 %v220_v41, %v220_v41  ;;  %v1565_v44 = vsub.f32 %v220_v41, %v1264_v39  ;;  %398 = vmatprep.mubr.bf16.mxu0 %v237_v40 }
 0x19d   :  { %v236_v45 = vpack.c.bf16 %v235_v42, %v233_v43  ;;  %v1569_v46 = vpack.c.bf16 %v1565_v44, %v1563_v38  ;;  %v1412_v43 = vld [vmem:[%s1755_s5 + $0x50] sm:$0xff]  }
 0x19f   :  { %399 = vmatmul.mubr.bf16.vlgmr.msra.gmra.mxu0 %v236_v45  ;;  %v1413_v45 = vld [vmem:[%s1755_s5 + $0x48] sm:$0xff]  }
 0x1a0   :  { %1286 = vmatprep.mubr.msk.f32.mxu0 %vm1430_vm1, %v1429_v47  ;;  %1271 = vmatpush3.msra.mxu0 %v1118_v48 }
 0x1a1   :  { %1272 = vmatprep.subr.mxu0 %v1429_v47 }
 0x1a2   :  { %1273 = vmatpush3.msra.mxu0 %v1117_v49 }
 0x1a3   :  { %1274 = vmatprep.subr.mxu0 %v1429_v47 }
 0x1a4   :  { %1275 = vmatpush3.msra.mxu0 %v1116_v50 }
 0x1a5   :  { %1276 = vmatprep.subr.mxu0 %v1429_v47 }
 0x1a6   :  { %1277 = vmatpush3.msra.mxu0 %v1115_v51 }
 0x1a7   :  { %1278 = vmatprep.subr.mxu0 %v1429_v47 }
 0x1a8   :  { %1279 = vmatpush3.msra.mxu0 %v1114_v52 }
 0x1a9   :  { %1280 = vmatprep.subr.mxu0 %v1429_v47 }
 0x1aa   :  { %1281 = vmatpush3.msra.mxu0 %v1113_v53 }
 0x1ab   :  { %1282 = vmatprep.subr.mxu0 %v1429_v47 }
 0x1ac   :  { %1283 = vmatpush3.msra.mxu0 %v1112_v54  ;;  %v995_v54 = vlaneseq }
 0x1ad   :  { %1284 = vmatprep.subr.mxu0 %v1429_v47 }
 0x1ae   :  { %1285 = vmatpush3.msra.mxu0 %v1111_v55 }
 0x1af   :  { %1334 = vmatprep.subr.bf16.mxu0 %v1429_v47 }
 0x25f   :  { %v1189_v56 = vpop.f32.mrf.mxu0 }
 0x261   :  { %v1190_v57 = vpop.f32.mrf.mxu0 }
 0x262   :  { %v1191_v58 = vadd.f32 %v1190_v57, %v1189_v56 }
 0x263   :  { %v1192_v59 = vpop.f32.mrf.mxu0 }
 0x264   :  { %1415 = vrsqrt.f32 %v1191_v58  ;;  %vm409_vm2 = vcmp.eq.f32.partialorder %v1191_v58, inf  ;;  %v412_v3 = vand.u32 2147483648, %v1191_v58  ;;  %vm411_vm4 = vcmp.eq.f32.partialorder %v1191_v58, 0.0 }
 0x265   :  { %v1193_v60 = vpop.f32.mrf.mxu0 }
 0x266   :  { %v1194_v61 = vadd.f32 %v1193_v60, %v1192_v59 }
 0x268   :  { %1417 = vrsqrt.f32 %v1194_v61  ;;  %vm416_vm3 = vcmp.eq.f32.partialorder %v1194_v61, inf  ;;  %v419_v4 = vand.u32 2147483648, %v1194_v61  ;;  %vm418_vm5 = vcmp.eq.f32.partialorder %v1194_v61, 0.0 }
 0x271   :  { %v1416_v62 = vpop.eup %1415 }
 0x272   :  { %v408_v63 = vmul.f32 %v1416_v62, %v1191_v58 }
 0x274   :  { %v410_v1 = vsel %vm409_vm2, %v1191_v58, %v408_v63  ;;  %v999_v58 = vand.u32 127, %v995_v54 }
 0x275   :  { %v1418_v0 = vpop.eup %1417  ;;  %v413_v6 = vsel %vm411_vm4, %v412_v3, %v410_v1 }
 0x276   :  { %v415_v2 = vmul.f32 %v1418_v0, %v1194_v61  ;;  %v1000_v62 = vand.u32 15, %v999_v58  ;;  %v1016_v0 = vand.u32 2147483647, %v1563_v38 }
 0x278   :  { %v417_v5 = vsel %vm416_vm3, %v1194_v61, %v415_v2  ;;  %v996_v61 = vshrl.u32 %v995_v54, 7  ;;  %vm1008_vm10 = vcmp.lt.s32.totalorder %v1000_v62, 4  ;;  %vm1003_vm14 = vcmp.lt.s32.totalorder %v1000_v62, 8 }
 0x279   :  { %v420_v7 = vsel %vm418_vm5, %v419_v4, %v417_v5  ;;  %v1432_v2 = vmov 0.00032552084  }
 0x27a   :  { %v421_v8 = vsub.f32 %v413_v6, %v420_v7  ;;  %vm1006_vm9 = vcmp.lt.s32.totalorder %v996_v61, 4  ;;  %v1018_v3 = vsel %vm1003_vm14, 0.0, %v1432_v2  ;;  %v1017_v7 = vand.u32 2147483647, %v1565_v44 }
 0x27b   :  { %vm1732_vm11 = vmand %vm1006_vm9, %vm1008_vm10  ;;  %vm1011_vm0 = vcmp.lt.s32.totalorder %v996_v61, 2 }
 0x27c   :  { %1266 = vmatpush3.msra.mxu1 %v421_v8  ;;  %vm1024_vm13 = vmxor %vm1732_vm11, %vm1431_vm12 }
 0x27d   :  { %1268 = vmatmul.mubr.msk.f32.vlgmr.msra.gmra.mxu1 %vm423_vm6, %v422_v9  ;;  %1289 = vmatprep.subr.mxu1 %v1429_v47  ;;  %vm1026_vm15 = vmand %vm1003_vm14, %vm1024_vm13 }
 0x27e   :  { %1290 = vmatpush3.msra.mxu1 %v587_v10  ;;  %1305 = vmatprep.mubr.msk.f32.mxu1 %vm1430_vm1, %v1429_v47  ;;  %v1028_v4 = vsel %vm1026_vm15, 0.0006510417, %v1429_v47 }
 0x27f   :  { %1291 = vmatprep.subr.mxu1 %v1429_v47 }
 0x280   :  { %1292 = vmatpush3.msra.mxu1 %v586_v11 }
 0x281   :  { %1293 = vmatprep.subr.mxu1 %v1429_v47 }
 0x282   :  { %1294 = vmatpush3.msra.mxu1 %v585_v12 }
 0x283   :  { %1295 = vmatprep.subr.mxu1 %v1429_v47 }
 0x284   :  { %1296 = vmatpush3.msra.mxu1 %v584_v13 }
 0x285   :  { %1297 = vmatprep.subr.mxu1 %v1429_v47 }
 0x286   :  { %1298 = vmatpush3.msra.mxu1 %v583_v14  ;;  %v1021_v14 = vmul.f32 0.00032552084, %v1017_v7 }
 0x287   :  { %1299 = vmatprep.subr.mxu1 %v1429_v47 }
 0x288   :  { %1300 = vmatpush3.msra.mxu1 %v582_v15 }
 0x289   :  { %1301 = vmatprep.subr.mxu1 %v1429_v47 }
 0x28a   :  { %1302 = vmatpush3.msra.mxu1 %v581_v16 }
 0x28b   :  { %1303 = vmatprep.subr.mxu1 %v1429_v47 }
 0x28c   :  { %1304 = vmatpush3.msra.mxu1 %v580_v17 }
 0x28d   :  { %1306 = vmatmul.mubr.msk.f32.vlgmr.msra.gmra.mxu1 %vm506_vm7, %v421_v8  ;;  %1308 = vmatprep.subr.bf16.mxu1 %v1429_v47  ;;  %v1020_v8 = vmul.f32 %v1018_v3, %v1016_v0 }
 0x28e   :  { %1309 = vmatpush3.bf16.msra.mxu1 %v1569_v46  ;;  %1310 = vmatprep.mubr.msk.bf16.mxu1 %vm1430_vm1, %v1429_v47 }
 0x28f   :  { %1314 = vmatprep.subr.bf16.mxu1 %v1429_v47 }
 0x291   :  { %1311 = vmatmul.mubr.msk.bf16.vlgmr.msra.gmra.mxu1 %vm664_vm8, %v1397_v18 }
 0x292   :  { %1315 = vmatpush3.bf16.msra.mxu1 %v1398_v19  ;;  %1330 = vmatprep.mubr.msk.bf16.mxu1 %vm1430_vm1, %v1429_v47 }
 0x293   :  { %1316 = vmatprep.subr.bf16.mxu1 %v1429_v47 }
 0x296   :  { %1317 = vmatpush3.bf16.msra.mxu1 %v1399_v20 }
 0x297   :  { %1318 = vmatprep.subr.bf16.mxu1 %v1429_v47 }
 0x29a   :  { %1319 = vmatpush3.bf16.msra.mxu1 %v1400_v21 }
 0x29b   :  { %1320 = vmatprep.subr.bf16.mxu1 %v1429_v47 }
 0x29e   :  { %1321 = vmatpush3.bf16.msra.mxu1 %v1402_v22 }
 0x29f   :  { %1322 = vmatprep.subr.bf16.mxu1 %v1429_v47 }
 0x2a2   :  { %1323 = vmatpush3.bf16.msra.mxu1 %v1403_v23 }
 0x2a3   :  { %1324 = vmatprep.subr.bf16.mxu1 %v1429_v47 }
 0x2a6   :  { %1325 = vmatpush3.bf16.msra.mxu1 %v1404_v24 }
 0x2a7   :  { %1326 = vmatprep.subr.bf16.mxu1 %v1429_v47 }
 0x2aa   :  { %1327 = vmatpush3.bf16.msra.mxu1 %v1405_v25 }
 0x2ab   :  { %1328 = vmatprep.subr.bf16.mxu1 %v1429_v47 }
 0x2ae   :  { %1329 = vmatpush3.bf16.msra.mxu1 %v1406_v26 }
 0x33d   :  { %v493_v27 = vpop.f32.mrf.mxu1 }
 0x33e   :  { %1287 = vmatmul.mubr.msk.f32.vlgmr.msra.gmra.mxu0 %vm506_vm7, %v493_v27 }
 0x33f   :  { %1335 = vmatpush3.bf16.msra.mxu0 %v1569_v46  ;;  %1336 = vmatprep.mubr.msk.bf16.mxu0 %vm1430_vm1, %v1429_v47  ;;  %v1269_v29 = vpop.f32.mrf.mxu1  ;;  %v1414_v46 = vld [vmem:[%s1755_s5 + $0x40] sm:$0xff]  }
 0x340   :  { %1340 = vmatprep.subr.bf16.mxu0 %v1429_v47 }
 0x342   :  { %1337 = vmatmul.mubr.msk.bf16.vlgmr.msra.gmra.mxu0 %vm664_vm8, %v1401_v28 }
 0x343   :  { %1341 = vmatpush3.bf16.msra.mxu0 %v1407_v30  ;;  %1356 = vmatprep.mubr.msk.bf16.mxu0 %vm1430_vm1, %v1429_v47  ;;  %vm1013_vm1 = vcmp.lt.s32.totalorder %v1000_v62, 2 }
 0x344   :  { %1342 = vmatprep.subr.bf16.mxu0 %v1429_v47  ;;  %vm1014_vm2 = vmand %vm1011_vm0, %vm1013_vm1 }
 0x345   :  { %vm1036_vm3 = vmxor %vm1014_vm2, %vm1431_vm12 }
 0x346   :  { %vm1038_vm4 = vmand %vm1732_vm11, %vm1036_vm3 }
 0x347   :  { %1343 = vmatpush3.bf16.msra.mxu0 %v1408_v31  ;;  %v1040_v23 = vsel %vm1038_vm4, 0.0013020834, %v1429_v47  ;;  %v1048_v31 = vsel %vm1014_vm2, 0.00048828125, %v1429_v47 }
 0x348   :  { %1344 = vmatprep.subr.bf16.mxu0 %v1429_v47 }
 0x34b   :  { %1345 = vmatpush3.bf16.msra.mxu0 %v1409_v32 }
 0x34c   :  { %1346 = vmatprep.subr.bf16.mxu0 %v1429_v47 }
 0x34d   :  { %v657_v34 = vpop.f32.mrf.mxu1 }
 0x34e   :  { %v661_v48 = vmul.f32 1.25, %v657_v34 }
 0x34f   :  { %v1307_v35 = vpop.f32.mrf.mxu1  ;;  %1347 = vmatpush3.bf16.msra.mxu0 %v1410_v33 }
 0x350   :  { %1348 = vmatprep.subr.bf16.mxu0 %v1429_v47 }
 0x351   :  { %v723_v37 = vpop.f32.mrf.mxu1 }
 0x353   :  { %v1312_v39 = vpop.f32.mrf.mxu1  ;;  %1349 = vmatpush3.bf16.msra.mxu0 %v1411_v36 }
 0x354   :  { %1350 = vmatprep.subr.bf16.mxu0 %v1429_v47 }
 0x355   :  { %v726_v40 = vpop.f32.mrf.mxu1 }
 0x356   :  { %v730_v41 = vpack.c.bf16 %v726_v40, %v723_v37 }
 0x357   :  { %v1313_v42 = vpop.f32.mrf.mxu1  ;;  %1351 = vmatpush3.bf16.msra.mxu0 %v1412_v43 }
 0x358   :  { %1331 = vmatmul.mubr.bf16.vlgmr.msra.gmra.mxu1 %v730_v41  ;;  %1352 = vmatprep.subr.bf16.mxu0 %v1429_v47 }
 0x35b   :  { %1353 = vmatpush3.bf16.msra.mxu0 %v1413_v45 }
 0x35c   :  { %1354 = vmatprep.subr.bf16.mxu0 %v1429_v47 }
 0x35f   :  { %1355 = vmatpush3.bf16.msra.mxu0 %v1414_v46 }
 0x3fe   :  { %v576_v49 = vpop.f32.mrf.mxu0 }
 0x3ff   :  { %v662_v50 = vsub.f32 %v576_v49, %v661_v48 }
 0x400   :  { %v1288_v51 = vpop.f32.mrf.mxu0 }
 0x401   :  { %v663_v52 = vmul.f32 %v662_v50, %v662_v50 }
 0x402   :  { %v881_v53 = vpop.f32.mrf.mxu0 }
 0x403   :  { %v665_v55 = vsel %vm664_vm8, %v663_v52, 0.0 }
 0x404   :  { %v1338_v56 = vpop.f32.mrf.mxu0  ;;  %666 = vadd.xlane.f32.xlu0 %v665_v55 }
 0x406   :  { %v884_v57 = vpop.f32.mrf.mxu0 }
 0x407   :  { %v888_v59 = vpack.c.bf16 %v884_v57, %v881_v53 }
 0x408   :  { %v1339_v60 = vpop.f32.mrf.mxu0 }
 0x409   :  { %1357 = vmatmul.mubr.bf16.vlgmr.msra.gmra.mxu0 %v888_v59 }
 0x418   :  { %v829_v1 = vpop.f32.mrf.mxu1 }
 0x419   :  { %v1022_v5 = vand.u32 2147483647, %v829_v1 }
 0x41a   :  { %v1332_v6 = vpop.f32.mrf.mxu1 }
 0x41b   :  { %v1030_v9 = vmul.f32 %v1028_v4, %v1022_v5 }
 0x41c   :  { %v832_v10 = vpop.f32.mrf.mxu1 }
 0x41d   :  { %v1032_v11 = vadd.f32 %v1030_v9, %v1020_v8  ;;  %v1023_v12 = vand.u32 2147483647, %v832_v10 }
 0x41e   :  { %v1333_v13 = vpop.f32.mrf.mxu1 }
 0x41f   :  { %v1031_v15 = vmul.f32 0.0, %v1023_v12 }
 0x421   :  { %v1033_v16 = vadd.f32 %v1031_v15, %v1021_v14 }
 0x48d   :  { %v667_v17 = vpop.xlane.xlu0 %666 }
 0x48e   :  { %v668_v38 = vrot.slane %v667_v17, 4 }
 0x490   :  { %v669_v18 = vadd.f32 %v668_v38, %v667_v17 }
 0x492   :  { %v670_v19 = vrot.slane %v669_v18, 2 }
 0x494   :  { %v671_v20 = vadd.f32 %v670_v19, %v669_v18 }
 0x496   :  { %v672_v21 = vrot.slane %v671_v20, 1 }
 0x498   :  { %v673_v22 = vadd.f32 %v672_v21, %v671_v20 }
 0x49a   :  { %1360 = vpush %v673_v22 }
 0x4c9   :  { %v988_v44 = vpop.f32.mrf.mxu0 }
 0x4ca   :  { %v1034_v24 = vand.u32 2147483647, %v988_v44  ;;  %v1046_v28 = vmul.f32 %v988_v44, %v988_v44 }
 0x4cb   :  { %v1358_v25 = vpop.f32.mrf.mxu0  ;;  %s1361_s5 = spop %1360 }
 0x4cc   :  { %v1042_v26 = vmul.f32 %v1040_v23, %v1034_v24  ;;  %v1050_v35 = vmul.f32 %v1048_v31, %v1046_v28  ;;  %s675_s1 = smul.f32 9.964923e-06, %s1361_s5 }
 0x4cd   :  { %v991_v27 = vpop.f32.mrf.mxu0 }
 0x4ce   :  { %v1035_v29 = vand.u32 2147483647, %v991_v27  ;;  %v1047_v30 = vmul.f32 %v991_v27, %v991_v27  ;;  %v1044_v34 = vadd.f32 %v1042_v26, %v1032_v11 }
 0x4cf   :  { %v1359_v32 = vpop.f32.mrf.mxu0 }
 0x4d0   :  { %v1043_v33 = vmul.f32 0.0, %v1035_v29  ;;  %v1051_v37 = vmul.f32 0.0, %v1047_v30  ;;  %v1052_v39 = vadd.f32 %v1050_v35, %v1044_v34 }
 0x4d2   :  { %v1045_v36 = vadd.f32 %v1043_v33, %v1033_v16 }
 0x4d4   :  { %v1053_v40 = vadd.f32 %v1051_v37, %v1045_v36 }
 0x4d6   :  { %v1054_v41 = vadd.f32 %v1053_v40, %v1052_v39 }
 0x4d8   :  { %1055 = vadd.xlane.f32.xlu0 %v1054_v41 }
 0x561   :  { %v1056_v42 = vpop.xlane.xlu0 %1055 }
 0x562   :  { %v1057_v43 = vrot.slane %v1056_v42, 4 }
 0x564   :  { %v1058_v45 = vadd.f32 %v1057_v43, %v1056_v42 }
 0x566   :  { %v1059_v46 = vrot.slane %v1058_v45, 2 }
 0x568   :  { %v1060_v48 = vadd.f32 %v1059_v46, %v1058_v45 }
 0x56a   :  { %v1061_v49 = vrot.slane %v1060_v48, 1 }
 0x56c   :  { %v1062_v50 = vadd.f32 %v1061_v49, %v1060_v48 }
 0x56e   :  { %1362 = vpush %v1062_v50 }
 0x59f   :  { %s1363_s22 = spop %1362 }
 0x5a0   :  { %s1064_s23 = sadd.f32 %s1363_s22, %s675_s1 }
 0x5a2   :  { %1066 = sst [smem:[#allocation2]] %s1064_s23 }
 0x5a3   :  { %1074 = dma.smem_to_hbm %s1433_s24, 16, %s1758_s8, [#allocation3]  }
 0x5a4   :  { %1427 = dma.done.wait [#allocation3], 16  }
 0x5a5   :  { %1428 = vsyncadd [#allocation3], 4294967280 }
 0x5a6   :  { %1078 = sfence }
 0x5a7   :  { %1079 = vsyncpa [#allocation3], 1 }

</bundles_post_ra>
